<compile_context>
chip_gen: v5e
topology: v5e:2x2
jax: 0.10.0
libtpu: 0.0.40
codegen_flags: <defaults>
</compile_context>

<pallas_src>
import jax
import jax.numpy as jnp
from jax.experimental import pallas as pl
from jax.experimental.pallas import tpu as pltpu


def _round_up(v: int, m: int) -> int:
    return (v + m - 1) // m * m


def _make_rgcn_kernel(xw_first: bool, compute_dtype):
    """Builds the kernel body. Grid = (row_tiles, R); R is the reduction."""

    def kernel(adj_ref, x_ref, w_ref, b_ref, o_ref):
        r = pl.program_id(1)

        @pl.when(r == 0)
        def _():
            o_ref[...] = jnp.zeros_like(o_ref)

        if xw_first:
            # out_r = adj[r, rows] @ (x @ W[r])  -- cheaper when F_out < F_in.
            xw = jnp.dot(x_ref[...], w_ref[...],
                         preferred_element_type=jnp.float32)
            contrib = jnp.dot(adj_ref[...], xw.astype(compute_dtype),
                              preferred_element_type=jnp.float32)
        else:
            # out_r = (adj[r, rows] @ x) @ W[r]  -- cheaper when F_in <= F_out.
            h = jnp.dot(adj_ref[...], x_ref[...],
                        preferred_element_type=jnp.float32)
            contrib = jnp.dot(h.astype(compute_dtype), w_ref[...],
                              preferred_element_type=jnp.float32)

        o_ref[...] += contrib

        @pl.when(r == pl.num_programs(1) - 1)
        def _():
            # Bias epilogue only on the last relation step (single lane-dense
            # broadcast-add, not repeated per iteration).
            o_ref[...] += b_ref[...]

    return kernel


def rgcn_forward(x, adj, weight, bias=None, *, compute_dtype=jnp.bfloat16):
    """x: (N, F_in), adj: (R, N, N), weight: (R, F_in, F_out), bias: (F_out,)."""
    N, F_in = x.shape
    R = adj.shape[0]
    F_out = weight.shape[2]

    # Pad node and feature dims to 128-multiples: lane-dense stores + MXU-native
    # tiles. Zero padding is exact: padded x rows/cols are zero, padded adj
    # rows only produce output rows that are sliced off below.
    N_pad = _round_up(N, 128)
    F_in_pad = _round_up(F_in, 128)
    F_out_pad = _round_up(F_out, 128)

    elt = jnp.dtype(compute_dtype).itemsize

    # Row tile over adj / out. Keep one adj tile <= ~4 MiB so the plan (with
    # double buffering) also fits v7x's 64 MiB physical VMEM with headroom.
    tm = 128
    for cand in (512, 256):
        if N_pad % cand == 0 and cand * N_pad * elt <= (4 << 20):
            tm = cand
            break

    if bias is None:
        bias = jnp.zeros((F_out,), jnp.float32)

    adj_p = jnp.pad(adj, ((0, 0), (0, N_pad - N), (0, N_pad - N))).astype(compute_dtype)
    x_p = jnp.pad(x, ((0, N_pad - N), (0, F_in_pad - F_in))).astype(compute_dtype)
    w_p = jnp.pad(weight, ((0, 0), (0, F_in_pad - F_in),
                           (0, F_out_pad - F_out))).astype(compute_dtype)
    b_p = jnp.pad(bias.astype(jnp.float32),
                  (0, F_out_pad - F_out)).reshape(1, F_out_pad)

    xw_first = F_out_pad < F_in_pad
    kernel = _make_rgcn_kernel(xw_first, compute_dtype)

    # Scoped-VMEM estimate: double-buffered blocks + headroom, capped so it
    # always fits v7x's 64 MiB physical VMEM.
    block_bytes = (tm * N_pad * elt                # adj row tile
                   + N_pad * F_in_pad * elt        # resident x
                   + F_in_pad * F_out_pad * elt    # W[r]
                   + F_out_pad * 4                 # bias
                   + tm * F_out_pad * 4)           # f32 output accumulator
    vmem_limit = int(min(max(2 * block_bytes + (4 << 20), 32 << 20), 48 << 20))

    out_p = pl.pallas_call(
        kernel,
        out_shape=jax.ShapeDtypeStruct((N_pad, F_out_pad), jnp.float32),
        grid_spec=pltpu.PrefetchScalarGridSpec(
            num_scalar_prefetch=0,
            grid=(N_pad // tm, R),  # rows parallel, relations reduce (innermost)
            in_specs=[
                # adj[r, i*tm:(i+1)*tm, :]
                pl.BlockSpec((pl.Squeezed(), tm, N_pad), lambda i, r: (r, i, 0)),
                # x resident in VMEM
                pl.BlockSpec((N_pad, F_in_pad), lambda i, r: (0, 0)),
                # W[r]
                pl.BlockSpec((pl.Squeezed(), F_in_pad, F_out_pad),
                             lambda i, r: (r, 0, 0)),
                # bias (resident)
                pl.BlockSpec((1, F_out_pad), lambda i, r: (0, 0)),
            ],
            # Output block constant across r -> resident f32 accumulator.
            out_specs=pl.BlockSpec((tm, F_out_pad), lambda i, r: (i, 0)),
        ),
        compiler_params=pltpu.CompilerParams(
            dimension_semantics=("parallel", "arbitrary"),
            vmem_limit_bytes=vmem_limit,
        ),
    )(adj_p, x_p, w_p, b_p)

    return out_p[:N, :F_out].astype(x.dtype)


if __name__ == "__main__":
    # Small shapes consistent with the module.
    R, N, F_in, F_out = 3, 16, 32, 32

    key = jax.random.PRNGKey(0)
    k_x, k_adj, k_w, k_b = jax.random.split(key, 4)

    # Deterministic parameter init mirroring reset_parameters():
    # uniform(-stdv, stdv) with stdv = 1/sqrt(out_features).
    stdv = 1.0 / (F_out ** 0.5)
    weight = jax.random.uniform(k_w, (R, F_in, F_out), jnp.float32, -stdv, stdv)
    bias = jax.random.uniform(k_b, (F_out,), jnp.float32, -stdv, stdv)

    # Inputs.
    x = jax.random.normal(k_x, (N, F_in), jnp.float32)
    adj = jax.random.uniform(k_adj, (R, N, N), jnp.float32)

    # Pure-JAX reference (same math as the PyTorch forward, all in f32).
    out_ref = jnp.matmul(jnp.matmul(adj, x), weight).sum(axis=0) + bias

    # Exact-precision path (f32 compute): tight correctness check.
    out_f32 = jax.block_until_ready(
        rgcn_forward(x, adj, weight, bias, compute_dtype=jnp.float32))
    assert out_f32.shape == (N, F_out)
    assert jnp.allclose(out_f32, out_ref, atol=1e-4, rtol=1e-4)

    # Default performance path (bf16 inputs, f32 MXU accumulation): loose check.
    out_bf16 = jax.block_until_ready(rgcn_forward(x, adj, weight, bias))
    assert out_bf16.shape == (N, F_out)
    assert jnp.allclose(out_bf16, out_ref, atol=5e-2, rtol=5e-2)

    print("KERNEL_OK")
</pallas_src>

<mosaic_0001>
module attributes {stable_mosaic.version = 11 : i64} {
  func.func @kernel(%arg0: i32, %arg1: i32, %arg2: memref<1x128x128xf32, #tpu.memory_space<vmem>>, %arg3: memref<128x128xf32, #tpu.memory_space<vmem>>, %arg4: memref<1x128x128xf32, #tpu.memory_space<vmem>>, %arg5: memref<1x128xf32, #tpu.memory_space<vmem>>, %arg6: memref<128x128xf32, #tpu.memory_space<vmem>>) attributes {dimension_semantics = [#tpu.dimension_semantics<parallel>, #tpu.dimension_semantics<arbitrary>], iteration_bounds = array<i64: 1, 3>, scalar_prefetch = 0 : i64, scratch_operands = 0 : i64, tpu.core_type = #tpu.core_type<tc>, window_params = [{transform_indices = @transform_0, window_bounds = array<i64: 1, 128, 128>}, {pipeline_mode = #tpu.pipeline_mode<synchronous>, transform_indices = @transform_1, window_bounds = array<i64: 128, 128>}, {transform_indices = @transform_2, window_bounds = array<i64: 1, 128, 128>}, {pipeline_mode = #tpu.pipeline_mode<synchronous>, transform_indices = @transform_3, window_bounds = array<i64: 1, 128>}, {transform_indices = @transform_4, window_bounds = array<i64: 128, 128>}]} {
    %c0_i32 = arith.constant 0 : i32
    %0 = arith.cmpi eq, %arg1, %c0_i32 : i32
    %1 = arith.extui %0 : i1 to i32
    %c0_i32_0 = arith.constant 0 : i32
    %2 = arith.cmpi ne, %1, %c0_i32_0 : i32
    scf.if %2 {
      %cst_14 = arith.constant 0.000000e+00 : f32
      %16 = vector.broadcast %cst_14 : f32 to vector<128x128xf32>
      %c0_15 = arith.constant 0 : index
      %c0_16 = arith.constant 0 : index
      %17 = vector.load %arg6[%c0_15, %c0_16] : memref<128x128xf32, #tpu.memory_space<vmem>>, vector<128x128xf32>
      tpu.vector_store %arg6[%c0_15, %c0_16], %16 {strides = array<i32>} : memref<128x128xf32, #tpu.memory_space<vmem>>, vector<128x128xf32>,
    } else {
    }
    %c0 = arith.constant 0 : index
    %c0_1 = arith.constant 0 : index
    %c0_2 = arith.constant 0 : index
    %3 = vector.load %arg2[%c0, %c0_1, %c0_2] : memref<1x128x128xf32, #tpu.memory_space<vmem>>, vector<1x128x128xf32>
    %4 = vector.shape_cast %3 : vector<1x128x128xf32> to vector<128x128xf32>
    %c0_3 = arith.constant 0 : index
    %c0_4 = arith.constant 0 : index
    %5 = vector.load %arg3[%c0_3, %c0_4] : memref<128x128xf32, #tpu.memory_space<vmem>>, vector<128x128xf32>
    %cst = arith.constant dense<0.000000e+00> : vector<128x128xf32>
    %6 = tpu.matmul %4, %5, %cst {dimension_numbers = #tpu.dot_dimension_numbers<[1], [0], [0], [1], [0, 0, 1, 1], [], []>} : vector<128x128xf32>, vector<128x128xf32>, vector<128x128xf32> -> vector<128x128xf32>
    %c0_5 = arith.constant 0 : index
    %c0_6 = arith.constant 0 : index
    %c0_7 = arith.constant 0 : index
    %7 = vector.load %arg4[%c0_5, %c0_6, %c0_7] : memref<1x128x128xf32, #tpu.memory_space<vmem>>, vector<1x128x128xf32>
    %8 = vector.shape_cast %7 : vector<1x128x128xf32> to vector<128x128xf32>
    %cst_8 = arith.constant dense<0.000000e+00> : vector<128x128xf32>
    %9 = tpu.matmul %6, %8, %cst_8 {dimension_numbers = #tpu.dot_dimension_numbers<[1], [0], [0], [1], [0, 0, 1, 1], [], []>} : vector<128x128xf32>, vector<128x128xf32>, vector<128x128xf32> -> vector<128x128xf32>
    %c0_9 = arith.constant 0 : index
    %c0_10 = arith.constant 0 : index
    %10 = vector.load %arg6[%c0_9, %c0_10] : memref<128x128xf32, #tpu.memory_space<vmem>>, vector<128x128xf32>
    %11 = arith.addf %10, %9 : vector<128x128xf32>
    %c0_11 = arith.constant 0 : index
    %c0_12 = arith.constant 0 : index
    %12 = vector.load %arg6[%c0_11, %c0_12] : memref<128x128xf32, #tpu.memory_space<vmem>>, vector<128x128xf32>
    tpu.vector_store %arg6[%c0_11, %c0_12], %11 {strides = array<i32>} : memref<128x128xf32, #tpu.memory_space<vmem>>, vector<128x128xf32>,
    %c2_i32 = arith.constant 2 : i32
    %13 = arith.cmpi eq, %arg1, %c2_i32 : i32
    %14 = arith.extui %13 : i1 to i32
    %c0_i32_13 = arith.constant 0 : i32
    %15 = arith.cmpi ne, %14, %c0_i32_13 : i32
    scf.if %15 {
      %c0_14 = arith.constant 0 : index
      %c0_15 = arith.constant 0 : index
      %16 = vector.load %arg6[%c0_14, %c0_15] : memref<128x128xf32, #tpu.memory_space<vmem>>, vector<128x128xf32>
      %c0_16 = arith.constant 0 : index
      %c0_17 = arith.constant 0 : index
      %17 = vector.load %arg5[%c0_16, %c0_17] : memref<1x128xf32, #tpu.memory_space<vmem>>, vector<1x128xf32>
      %18 = vector.broadcast %17 : vector<1x128xf32> to vector<128x128xf32>
      %19 = arith.addf %16, %18 : vector<128x128xf32>
      %c0_18 = arith.constant 0 : index
      %c0_19 = arith.constant 0 : index
      %20 = vector.load %arg6[%c0_18, %c0_19] : memref<128x128xf32, #tpu.memory_space<vmem>>, vector<128x128xf32>
      tpu.vector_store %arg6[%c0_18, %c0_19], %19 {strides = array<i32>} : memref<128x128xf32, #tpu.memory_space<vmem>>, vector<128x128xf32>,
    } else {
    }
    return
  }
  func.func @transform_0(%arg0: i32, %arg1: i32) -> (i32, i32, i32) {
    %c0_i32 = arith.constant 0 : i32
    %c0_i32_0 = arith.constant 0 : i32
    return %arg1, %arg0, %c0_i32 : i32, i32, i32
  }
  func.func @transform_1(%arg0: i32, %arg1: i32) -> (i32, i32) {
    %c0_i32 = arith.constant 0 : i32
    %c0_i32_0 = arith.constant 0 : i32
    %c0_i32_1 = arith.constant 0 : i32
    return %c0_i32, %c0_i32_0 : i32, i32
  }
  func.func @transform_2(%arg0: i32, %arg1: i32) -> (i32, i32, i32) {
    %c0_i32 = arith.constant 0 : i32
    %c0_i32_0 = arith.constant 0 : i32
    %c0_i32_1 = arith.constant 0 : i32
    return %arg1, %c0_i32, %c0_i32_0 : i32, i32, i32
  }
  func.func @transform_3(%arg0: i32, %arg1: i32) -> (i32, i32) {
    %c0_i32 = arith.constant 0 : i32
    %c0_i32_0 = arith.constant 0 : i32
    %c0_i32_1 = arith.constant 0 : i32
    return %c0_i32, %c0_i32_0 : i32, i32
  }
  func.func @transform_4(%arg0: i32, %arg1: i32) -> (i32, i32) {
    %c0_i32 = arith.constant 0 : i32
    %c0_i32_0 = arith.constant 0 : i32
    return %arg0, %c0_i32 : i32, i32
  }
}

</mosaic_0001>

<bundles_post_ra>
// kernel: tpu_custom_call.1
= control target key start
LH: loop header
LB: loop body
LE: loop exit
PB: predicated region body
PF: predicated region fallthrough
CT: control target
= control target key end

     0   :  { %9 = vsyncpa [#allocation3], 0  ;;  %s1209_s0 = inlined_call_operand.hbm [shape: f32[3,128,128], index: 0, kind: input, shape index: {}]   ;;  %s1210_s1 = inlined_call_operand.hbm [shape: f32[128,128], index: 1, kind: input, shape index: {}]   ;;  %s1211_s2 = inlined_call_operand.hbm [shape: f32[3,128,128], index: 2, kind: input, shape index: {}]   ;;  %s1212_s3 = inlined_call_operand.vmem [shape: f32[1,128], index: 3, kind: input, shape index: {}]   ;;  %s1213_s4 = inlined_call_operand.hbm [shape: f32[128,128], index: 4, kind: output, shape index: {}]  }
   0x1   :  { %11 = vsyncpa [#allocation3 + $0x1], 0 }
   0x2   :  { %12 = vsyncpa [#allocation6], 0 }
   0x3   :  { %13 = vsyncpa [#allocation4], 0  ;;  %s1047_s15 = smov 0   ;;  %s1049_s16 = smov 0  }
   0x4   :  { %s1051_s17 = smov 0   ;;  %s1053_s18 = smov 0  }
   0x5   :  { %s1055_s19 = smov 0   ;;  %s1057_s20 = smov 0  }
   0x6 LB: > { %s28_s21 = sadd.s32 1, %s1009_s19  ;;  %s40_s22 = sadd.s32 1, %s1001_s17  ;;  %s1013_s20 = sphi %s1057_s20, %s19_s20   ;;  %s1009_s19 = sphi %s1055_s19, %s1221_s19   ;;  %s1005_s18 = sphi %s1053_s18, %s1220_s18   ;;  %s1001_s17 = sphi %s1051_s17, %s1219_s17   ;;  %s997_s16 = sphi %s1049_s16, %s1218_s16   ;;  %s993_s15 = sphi %s1047_s15, %s1217_s15  }
   0x7   : > { %p29_p0 = scmp.ge.s32.totalorder %s28_s21, 3  ;;  %p47_p1 = scmp.ne.s32.totalorder %s1001_s17, %s997_s16 }
   0x8   : > { %p48_p2 = scmp.eq.s32.totalorder %s1013_s20, 0  ;;  %p773_p5 = scmp.lt.s32.totalorder %s1013_s20, 3 }
   0x9   : > { %s1223_s21 = smov (%p29_p0, %s28_s21), 0  ;;  %s188_s25 = sand.u32 1, %s1013_s20  }
   0xa   : > { %p1084_p3 = por %p48_p2, %p47_p1  ;;  %s35_s24 = ssub.s32 %s1009_s19, %s1223_s21 }
   0xb   : > { %p38_p4 = scmp.eq.s32.totalorder %s35_s24, 0  ;;  %s190_s26 = sand.u32 1, %s1001_s17  }
   0xc   : > { %s699_s28 = sshll.u32 %s190_s26, 7  ;;  %s715_s29 = sshll.u32 %s1009_s19, 7 }
   0xd   : > { %s1094_s27 = scalar_select %p38_p4, %s1001_s17, %s40_s22  }
   0xe   : > { %s199_s6 = scalar_lea.hbm %s1209_s0, %s715_s29  ;;  %s192_s7 = scalar_lea.vmem [#allocation2], %s699_s28 }
   0xf   : > { %s202_s8 = sshll.u32 %s192_s7, 4  ;;  %s200_s9 = sshll.u32 %s199_s6, 4  ;;  %s203_s8 = int_to_ptr.vmem [resolvable:$true] %s202_s8  ;;  %s201_s9 = int_to_ptr.hbm [resolvable:$true] %s200_s9 }
  0x10   : > { %p1102_p6 = pnand %p773_p5, %p1084_p3  ;;  %s221_s13 = scalar_lea.hbm %s1211_s2, %s715_s29 }
  0x11   : > { %s222_s14 = sshll.u32 %s221_s13, 4  ;;  %s189_s22 = scalar_lea.sflag [#allocation3], %s188_s25  ;;  %s223_s14 = int_to_ptr.hbm [resolvable:$true] %s222_s14 }
  0x12   : > { %s1015_s24 = smov 128   ;;  %s1016_s26 = smov 8  }
  0x13   : > { %768 = dma.hbm_to_vmem [thread:$0]  (!%p1102_p6), %s201_s9, 2048, %s203_s8, %s189_s22, %s1015_s24, %s1015_s24, %s1016_s26  }
  0x14   : > { %s216_s30 = scalar_lea.vmem [#allocation7], %s699_s28  ;;  %s1112_s23 = sadd.s32 4294967295, %s1013_s20  }
  0x15   : > { %s224_s5 = sshll.u32 %s216_s30, 4  ;;  %p53_p7 = scmp.ne.s32.totalorder %s997_s16, %s993_s15  ;;  %s225_s5 = int_to_ptr.vmem [resolvable:$true] %s224_s5 }
  0x16   : > { %p54_p8 = scmp.eq.s32.totalorder %s1112_s23, 0  ;;  %p696_p9 = scmp.ge.s32.totalorder %s1013_s20, 1 }
  0x17   : > { %p158_p10 = scmp.lt.s32.totalorder %s1013_s20, 4  ;;  %s169_s28 = sshll.u32 %s1210_s1, 4  ;;  %s170_s28 = int_to_ptr.hbm [resolvable:$true] %s169_s28 }
  0x18   : > { %p1121_p11 = por %p54_p8, %p53_p7  ;;  %s1017_s7 = smov [#allocation5]  }
  0x19   : > { %p159_p12 = pnand %p696_p9, %p158_p10  ;;  %s171_s8 = sshll.u32 %s1017_s7, 4  ;;  %s172_s8 = int_to_ptr.vmem [resolvable:$true] %s171_s8 }
  0x1a   : > { %771 = dma.hbm_to_vmem [thread:$0]  (!%p1102_p6), %s223_s14, 2048, %s225_s5, %s189_s22, %s1015_s24, %s1015_s24, %s1016_s26  }
  0x1b   : > { %p761_p13 = pneg %p159_p12  ;;  %236 = sbr.rel (%p159_p12) target bundleno = 442 (0x1ba), region = 36 }
  0x1c   : > { %s238_s15 = sand.u32 (!%p159_p12), 1, %s1112_s23   ;;  %s240_s9 = sand.u32 (!%p159_p12), 1, %s997_s16  }
  0x1d   : > { %p762_p0 = pnand %p761_p13, %p54_p8  ;;  %s706_s11 = sshll.u32 (!%p159_p12), %s240_s9, 7 }
  0x1e   : > { %s239_s12 = scalar_lea.sflag (!%p159_p12), [#allocation3], %s238_s15  ;;  %s1134_s13 = scalar_lea.vmem (!%p159_p12), [#allocation2], %s706_s11 }
  0x1f   : > { %764 = dma.hbm_to_vmem [thread:$0]  (!%p762_p0), %s170_s28, 2048, %s172_s8, [#allocation6], %s1015_s24, %s1015_s24, %s1016_s26  }
  0x20   : > { %976 = dma.done.wait (%p1121_p11), %s239_s12, 2048  }
  0x21   : > { %978 = vsyncadd (%p1121_p11), %s239_s12, 4294965248 }
  0x22   : > { %980 = dma.done.wait (%p54_p8), [#allocation6], 2048  }
  0x23   : > { %982 = vsyncadd (%p54_p8), [#allocation6], 4294965248  ;;  %s1144_s10 = scalar_lea.vmem [#allocation7], %s706_s11 }
  0x24   : > { %984 = dma.done.wait (%p1121_p11), %s239_s12, 2048  }
  0x25   : > { %986 = vsyncadd (%p1121_p11), %s239_s12, 4294965248  ;;  %p709_p1 = scmp.ne.s32.totalorder %s1005_s18, 0 }
  0x27   : > { %288 = sbr.rel (%p709_p1) target bundleno = 61 (0x3d), region = 52 }
  0x2c   : > { %v1018_v0 = vmov 0.0  }
  0x2d   : > { %289 = vst [vmem:[#allocation8] sm:$0xff] %v1018_v0 }
  0x2e   : > { %290 = vst [vmem:[#allocation8 + $0x8] sm:$0xff] %v1018_v0 }
  0x2f   : > { %291 = vst [vmem:[#allocation8 + $0x10] sm:$0xff] %v1018_v0 }
  0x30   : > { %292 = vst [vmem:[#allocation8 + $0x18] sm:$0xff] %v1018_v0 }
  0x31   : > { %293 = vst [vmem:[#allocation8 + $0x20] sm:$0xff] %v1018_v0 }
  0x32   : > { %294 = vst [vmem:[#allocation8 + $0x28] sm:$0xff] %v1018_v0 }
  0x33   : > { %295 = vst [vmem:[#allocation8 + $0x30] sm:$0xff] %v1018_v0 }
  0x34   : > { %296 = vst [vmem:[#allocation8 + $0x38] sm:$0xff] %v1018_v0 }
  0x35   : > { %297 = vst [vmem:[#allocation8 + $0x40] sm:$0xff] %v1018_v0 }
  0x36   : > { %298 = vst [vmem:[#allocation8 + $0x48] sm:$0xff] %v1018_v0 }
  0x37   : > { %299 = vst [vmem:[#allocation8 + $0x50] sm:$0xff] %v1018_v0 }
  0x38   : > { %300 = vst [vmem:[#allocation8 + $0x58] sm:$0xff] %v1018_v0 }
  0x39   : > { %301 = vst [vmem:[#allocation8 + $0x60] sm:$0xff] %v1018_v0 }
  0x3a   : > { %302 = vst [vmem:[#allocation8 + $0x68] sm:$0xff] %v1018_v0 }
  0x3b   : > { %303 = vst [vmem:[#allocation8 + $0x70] sm:$0xff] %v1018_v0 }
  0x3c   : > { %304 = vst [vmem:[#allocation8 + $0x78] sm:$0xff] %v1018_v0 }
  0x3d PF: > { %v336_v1 = vld [vmem:[#allocation5 + $0x78] sm:$0xff]  ;;  %v335_v2 = vld [vmem:[#allocation5 + $0x70] sm:$0xff]  ;;  %v334_v3 = vld [vmem:[#allocation5 + $0x68] sm:$0xff]  ;;  %p710_p2 = scmp.ne.s32.totalorder %s1005_s18, 2 }
  0x3e   : > { %717 = vmatpush.msra.mxu2 %v336_v1  ;;  %337 = vmatpush.msra.mxu0 %v336_v1  ;;  %v333_v4 = vld [vmem:[#allocation5 + $0x60] sm:$0xff]  ;;  %v332_v5 = vld [vmem:[#allocation5 + $0x58] sm:$0xff]  ;;  %v331_v6 = vld [vmem:[#allocation5 + $0x50] sm:$0xff] }
  0x3f   : > { %v330_v7 = vld [vmem:[#allocation5 + $0x48] sm:$0xff]  ;;  %v329_v8 = vld [vmem:[#allocation5 + $0x40] sm:$0xff]  ;;  %v328_v9 = vld [vmem:[#allocation5 + $0x38] sm:$0xff] }
  0x40   : > { %718 = vmatpush.msra.mxu2 %v335_v2  ;;  %338 = vmatpush.msra.mxu0 %v335_v2  ;;  %v327_v10 = vld [vmem:[#allocation5 + $0x30] sm:$0xff]  ;;  %v326_v11 = vld [vmem:[#allocation5 + $0x28] sm:$0xff]  ;;  %v325_v12 = vld [vmem:[#allocation5 + $0x20] sm:$0xff] }
  0x41   : > { %v324_v13 = vld [vmem:[#allocation5 + $0x18] sm:$0xff]  ;;  %v323_v14 = vld [vmem:[#allocation5 + $0x10] sm:$0xff]  ;;  %v322_v15 = vld [vmem:[#allocation5 + $0x8] sm:$0xff] }
  0x42   : > { %719 = vmatpush.msra.mxu2 %v334_v3  ;;  %339 = vmatpush.msra.mxu0 %v334_v3  ;;  %v321_v16 = vld [vmem:[#allocation5] sm:$0xff]  ;;  %v314_v19 = vld [vmem:[%s1134_s13 + $0x48] sm:$0xff]  ;;  %v315_v21 = vld [vmem:[%s1134_s13 + $0x50] sm:$0xff] }
  0x43   : > { %v313_v17 = vld [vmem:[%s1134_s13 + $0x40] sm:$0xff]  ;;  %v306_v20 = vld [vmem:[%s1134_s13 + $0x8] sm:$0xff]  ;;  %v307_v22 = vld [vmem:[%s1134_s13 + $0x10] sm:$0xff] }
  0x44   : > { %720 = vmatpush.msra.mxu2 %v333_v4  ;;  %340 = vmatpush.msra.mxu0 %v333_v4  ;;  %v305_v18 = vld [vmem:[%s1134_s13] sm:$0xff]  ;;  %v316_v23 = vld [vmem:[%s1134_s13 + $0x58] sm:$0xff]  ;;  %v416_v26 = vld [vmem:[%s1144_s10 + $0x70] sm:$0xff] }
  0x45   : > { %v308_v24 = vld [vmem:[%s1134_s13 + $0x18] sm:$0xff]  ;;  %v415_v27 = vld [vmem:[%s1144_s10 + $0x68] sm:$0xff]  ;;  %v414_v28 = vld [vmem:[%s1144_s10 + $0x60] sm:$0xff] }
  0x46   : > { %721 = vmatpush.msra.mxu2 %v332_v5  ;;  %341 = vmatpush.msra.mxu0 %v332_v5  ;;  %v417_v25 = vld [vmem:[%s1144_s10 + $0x78] sm:$0xff]  ;;  %v317_v29 = vld [vmem:[%s1134_s13 + $0x60] sm:$0xff]  ;;  %v412_v32 = vld [vmem:[%s1144_s10 + $0x50] sm:$0xff] }
  0x47   : > { %733 = vmatpush.msra.mxu3 %v417_v25  ;;  %418 = vmatpush.msra.mxu1 %v417_v25  ;;  %v309_v30 = vld [vmem:[%s1134_s13 + $0x20] sm:$0xff]  ;;  %v413_v31 = vld [vmem:[%s1144_s10 + $0x58] sm:$0xff]  ;;  %v411_v33 = vld [vmem:[%s1144_s10 + $0x48] sm:$0xff] }
  0x48   : > { %722 = vmatpush.msra.mxu2 %v331_v6  ;;  %342 = vmatpush.msra.mxu0 %v331_v6  ;;  %v410_v34 = vld [vmem:[%s1144_s10 + $0x40] sm:$0xff]  ;;  %v318_v35 = vld [vmem:[%s1134_s13 + $0x68] sm:$0xff]  ;;  %v409_v37 = vld [vmem:[%s1144_s10 + $0x38] sm:$0xff] }
  0x49   : > { %734 = vmatpush.msra.mxu3 %v416_v26  ;;  %419 = vmatpush.msra.mxu1 %v416_v26  ;;  %v310_v36 = vld [vmem:[%s1134_s13 + $0x28] sm:$0xff]  ;;  %v408_v38 = vld [vmem:[%s1144_s10 + $0x30] sm:$0xff]  ;;  %v406_v40 = vld [vmem:[%s1144_s10 + $0x20] sm:$0xff] }
  0x4a   : > { %723 = vmatpush.msra.mxu2 %v330_v7  ;;  %343 = vmatpush.msra.mxu0 %v330_v7  ;;  %v407_v39 = vld [vmem:[%s1144_s10 + $0x28] sm:$0xff]  ;;  %v319_v41 = vld [vmem:[%s1134_s13 + $0x70] sm:$0xff]  ;;  %v405_v43 = vld [vmem:[%s1144_s10 + $0x18] sm:$0xff] }
  0x4b   : > { %735 = vmatpush.msra.mxu3 %v415_v27  ;;  %420 = vmatpush.msra.mxu1 %v415_v27  ;;  %v311_v42 = vld [vmem:[%s1134_s13 + $0x30] sm:$0xff]  ;;  %v403_v45 = vld [vmem:[%s1144_s10 + $0x8] sm:$0xff]  ;;  %v320_v46 = vld [vmem:[%s1134_s13 + $0x78] sm:$0xff] }
  0x4c   : > { %724 = vmatpush.msra.mxu2 %v329_v8  ;;  %344 = vmatpush.msra.mxu0 %v329_v8  ;;  %v404_v44 = vld [vmem:[%s1144_s10 + $0x10] sm:$0xff]  ;;  %v312_v47 = vld [vmem:[%s1134_s13 + $0x38] sm:$0xff]  ;;  %v402_v48 = vld [vmem:[%s1144_s10] sm:$0xff] }
  0x4d   : > { %736 = vmatpush.msra.mxu3 %v414_v28  ;;  %421 = vmatpush.msra.mxu1 %v414_v28  ;;  %v483_v1 = vld [vmem:[#allocation8] sm:$0xff]  ;;  %v484_v4 = vld [vmem:[#allocation8 + $0x8] sm:$0xff]  ;;  %v494_v25 = vld [vmem:[#allocation8 + $0x58] sm:$0xff] }
  0x4e   : > { %725 = vmatpush.msra.mxu2 %v328_v9  ;;  %345 = vmatpush.msra.mxu0 %v328_v9  ;;  %v491_v7 = vld [vmem:[#allocation8 + $0x40] sm:$0xff]  ;;  %v488_v28 = vld [vmem:[#allocation8 + $0x28] sm:$0xff] }
  0x4f   : > { %737 = vmatpush.msra.mxu3 %v413_v31  ;;  %422 = vmatpush.msra.mxu1 %v413_v31  ;;  %v495_v31 = vld [vmem:[#allocation8 + $0x60] sm:$0xff] }
  0x50   : > { %726 = vmatpush.msra.mxu2 %v327_v10  ;;  %346 = vmatpush.msra.mxu0 %v327_v10  ;;  %v485_v10 = vld [vmem:[#allocation8 + $0x10] sm:$0xff] }
  0x51   : > { %738 = vmatpush.msra.mxu3 %v412_v32  ;;  %423 = vmatpush.msra.mxu1 %v412_v32 }
  0x52   : > { %727 = vmatpush.msra.mxu2 %v326_v11  ;;  %347 = vmatpush.msra.mxu0 %v326_v11 }
  0x53   : > { %739 = vmatpush.msra.mxu3 %v411_v33  ;;  %424 = vmatpush.msra.mxu1 %v411_v33 }
  0x54   : > { %728 = vmatpush.msra.mxu2 %v325_v12  ;;  %348 = vmatpush.msra.mxu0 %v325_v12 }
  0x55   : > { %740 = vmatpush.msra.mxu3 %v410_v34  ;;  %425 = vmatpush.msra.mxu1 %v410_v34  ;;  %v489_v34 = vld [vmem:[#allocation8 + $0x30] sm:$0xff] }
  0x56   : > { %729 = vmatpush.msra.mxu2 %v324_v13  ;;  %349 = vmatpush.msra.mxu0 %v324_v13  ;;  %v492_v13 = vld [vmem:[#allocation8 + $0x48] sm:$0xff] }
  0x57   : > { %741 = vmatpush.msra.mxu3 %v409_v37  ;;  %426 = vmatpush.msra.mxu1 %v409_v37  ;;  %v496_v37 = vld [vmem:[#allocation8 + $0x68] sm:$0xff] }
  0x58   : > { %730 = vmatpush.msra.mxu2 %v323_v14  ;;  %350 = vmatpush.msra.mxu0 %v323_v14 }
  0x59   : > { %742 = vmatpush.msra.mxu3 %v408_v38  ;;  %427 = vmatpush.msra.mxu1 %v408_v38 }
  0x5a   : > { %731 = vmatpush.msra.mxu2 %v322_v15  ;;  %351 = vmatpush.msra.mxu0 %v322_v15 }
  0x5b   : > { %743 = vmatpush.msra.mxu3 %v407_v39  ;;  %428 = vmatpush.msra.mxu1 %v407_v39 }
  0x5c   : > { %732 = vmatpush.msra.mxu2 %v321_v16  ;;  %352 = vmatpush.msra.mxu0 %v321_v16  ;;  %v486_v16 = vld [vmem:[#allocation8 + $0x18] sm:$0xff] }
  0x5d   : > { %377 = vmatmul.f32.vlgmr.msra.gmra.mxu2 %v313_v17  ;;  %353 = vmatmul.f32.vlgmr.msra.gmra.mxu0 %v305_v18 }
  0x5e   : > { %744 = vmatpush.msra.mxu3 %v406_v40  ;;  %429 = vmatpush.msra.mxu1 %v406_v40  ;;  %v490_v40 = vld [vmem:[#allocation8 + $0x38] sm:$0xff] }
  0x60   : > { %745 = vmatpush.msra.mxu3 %v405_v43  ;;  %430 = vmatpush.msra.mxu1 %v405_v43  ;;  %v497_v43 = vld [vmem:[#allocation8 + $0x70] sm:$0xff] }
  0x62   : > { %746 = vmatpush.msra.mxu3 %v404_v44  ;;  %431 = vmatpush.msra.mxu1 %v404_v44 }
  0x64   : > { %747 = vmatpush.msra.mxu3 %v403_v45  ;;  %432 = vmatpush.msra.mxu1 %v403_v45 }
  0x65   : > { %380 = vmatmul.f32.gmra.mxu2 %v314_v19  ;;  %356 = vmatmul.f32.gmra.mxu0 %v306_v20  ;;  %v493_v19 = vld [vmem:[#allocation8 + $0x50] sm:$0xff] }
  0x66   : > { %748 = vmatpush.msra.mxu3 %v402_v48  ;;  %433 = vmatpush.msra.mxu1 %v402_v48 }
  0x6d   : > { %383 = vmatmul.f32.gmra.mxu2 %v315_v21  ;;  %359 = vmatmul.f32.gmra.mxu0 %v307_v22  ;;  %v487_v22 = vld [vmem:[#allocation8 + $0x20] sm:$0xff] }
  0x75   : > { %386 = vmatmul.f32.gmra.mxu2 %v316_v23  ;;  %362 = vmatmul.f32.gmra.mxu0 %v308_v24 }
  0x7d   : > { %389 = vmatmul.f32.gmra.mxu2 %v317_v29  ;;  %365 = vmatmul.f32.gmra.mxu0 %v309_v30 }
  0x85   : > { %392 = vmatmul.f32.gmra.mxu2 %v318_v35  ;;  %368 = vmatmul.f32.gmra.mxu0 %v310_v36 }
  0x8d   : > { %395 = vmatmul.f32.gmra.mxu2 %v319_v41  ;;  %371 = vmatmul.f32.gmra.mxu0 %v311_v42 }
  0x95   : > { %398 = vmatmul.f32.gmra.mxu2 %v320_v46  ;;  %374 = vmatmul.f32.gmra.mxu0 %v312_v47  ;;  %v498_v46 = vld [vmem:[#allocation8 + $0x78] sm:$0xff] }
  0xda   : > { %v354_v49 = vpop.f32.mrf.mxu0 }
  0xdb   : > { %434 = vmatmul.f32.vlgmr.msra.gmra.mxu1 %v354_v49 }
  0xe0   : > { %v378_v50 = vpop.f32.mrf.mxu2 }
  0xe1   : > { %458 = vmatmul.f32.vlgmr.msra.gmra.mxu3 %v378_v50 }
  0xe2   : > { %v357_v51 = vpop.f32.mrf.mxu0 }
  0xe3   : > { %437 = vmatmul.f32.gmra.mxu1 %v357_v51 }
  0xe8   : > { %v381_v52 = vpop.f32.mrf.mxu2 }
  0xe9   : > { %461 = vmatmul.f32.gmra.mxu3 %v381_v52 }
  0xea   : > { %v360_v53 = vpop.f32.mrf.mxu0 }
  0xeb   : > { %440 = vmatmul.f32.gmra.mxu1 %v360_v53 }
  0xf0   : > { %v384_v54 = vpop.f32.mrf.mxu2 }
  0xf1   : > { %464 = vmatmul.f32.gmra.mxu3 %v384_v54 }
  0xf2   : > { %v363_v55 = vpop.f32.mrf.mxu0 }
  0xf3   : > { %443 = vmatmul.f32.gmra.mxu1 %v363_v55 }
  0xf8   : > { %v387_v56 = vpop.f32.mrf.mxu2 }
  0xf9   : > { %467 = vmatmul.f32.gmra.mxu3 %v387_v56 }
  0xfa   : > { %v366_v57 = vpop.f32.mrf.mxu0 }
  0xfb   : > { %446 = vmatmul.f32.gmra.mxu1 %v366_v57 }
 0x100   : > { %v390_v58 = vpop.f32.mrf.mxu2 }
 0x101   : > { %470 = vmatmul.f32.gmra.mxu3 %v390_v58 }
 0x102   : > { %v369_v59 = vpop.f32.mrf.mxu0 }
 0x103   : > { %449 = vmatmul.f32.gmra.mxu1 %v369_v59 }
 0x108   : > { %v393_v60 = vpop.f32.mrf.mxu2 }
 0x109   : > { %473 = vmatmul.f32.gmra.mxu3 %v393_v60 }
 0x10a   : > { %v372_v61 = vpop.f32.mrf.mxu0 }
 0x10b   : > { %452 = vmatmul.f32.gmra.mxu1 %v372_v61 }
 0x110   : > { %v396_v62 = vpop.f32.mrf.mxu2 }
 0x111   : > { %476 = vmatmul.f32.gmra.mxu3 %v396_v62 }
 0x112   : > { %v375_v63 = vpop.f32.mrf.mxu0 }
 0x113   : > { %455 = vmatmul.f32.gmra.mxu1 %v375_v63 }
 0x118   : > { %v399_v0 = vpop.f32.mrf.mxu2 }
 0x119   : > { %479 = vmatmul.f32.gmra.mxu3 %v399_v0 }
 0x158   : > { %v435_v2 = vpop.f32.mrf.mxu1 }
 0x159   : > { %v499_v3 = vadd.f32 %v483_v1, %v435_v2 }
 0x15b   : > { %515 = vst [vmem:[#allocation8] sm:$0xff] %v499_v3 }
 0x160   : > { %v438_v5 = vpop.f32.mrf.mxu1 }
 0x161   : > { %v500_v6 = vadd.f32 %v484_v4, %v438_v5 }
 0x163   : > { %516 = vst [vmem:[#allocation8 + $0x8] sm:$0xff] %v500_v6 }
 0x164   : > { %v459_v8 = vpop.f32.mrf.mxu3 }
 0x165   : > { %v507_v9 = vadd.f32 %v491_v7, %v459_v8 }
 0x167   : > { %523 = vst [vmem:[#allocation8 + $0x40] sm:$0xff] %v507_v9 }
 0x168   : > { %v441_v11 = vpop.f32.mrf.mxu1 }
 0x169   : > { %v501_v12 = vadd.f32 %v485_v10, %v441_v11 }
 0x16b   : > { %517 = vst [vmem:[#allocation8 + $0x10] sm:$0xff] %v501_v12 }
 0x16c   : > { %v462_v14 = vpop.f32.mrf.mxu3 }
 0x16d   : > { %v508_v15 = vadd.f32 %v492_v13, %v462_v14 }
 0x16f   : > { %524 = vst [vmem:[#allocation8 + $0x48] sm:$0xff] %v508_v15 }
 0x170   : > { %v444_v17 = vpop.f32.mrf.mxu1 }
 0x171   : > { %v502_v18 = vadd.f32 %v486_v16, %v444_v17 }
 0x173   : > { %518 = vst [vmem:[#allocation8 + $0x18] sm:$0xff] %v502_v18 }
 0x174   : > { %v465_v20 = vpop.f32.mrf.mxu3 }
 0x175   : > { %v509_v21 = vadd.f32 %v493_v19, %v465_v20 }
 0x177   : > { %525 = vst [vmem:[#allocation8 + $0x50] sm:$0xff] %v509_v21 }
 0x178   : > { %v447_v23 = vpop.f32.mrf.mxu1 }
 0x179   : > { %v503_v24 = vadd.f32 %v487_v22, %v447_v23 }
 0x17b   : > { %519 = vst [vmem:[#allocation8 + $0x20] sm:$0xff] %v503_v24 }
 0x17c   : > { %v468_v26 = vpop.f32.mrf.mxu3 }
 0x17d   : > { %v510_v27 = vadd.f32 %v494_v25, %v468_v26 }
 0x17f   : > { %526 = vst [vmem:[#allocation8 + $0x58] sm:$0xff] %v510_v27 }
 0x180   : > { %v450_v29 = vpop.f32.mrf.mxu1 }
 0x181   : > { %v504_v30 = vadd.f32 %v488_v28, %v450_v29 }
 0x183   : > { %520 = vst [vmem:[#allocation8 + $0x28] sm:$0xff] %v504_v30 }
 0x184   : > { %v471_v32 = vpop.f32.mrf.mxu3 }
 0x185   : > { %v511_v33 = vadd.f32 %v495_v31, %v471_v32 }
 0x187   : > { %527 = vst [vmem:[#allocation8 + $0x60] sm:$0xff] %v511_v33 }
 0x188   : > { %v453_v35 = vpop.f32.mrf.mxu1 }
 0x189   : > { %v505_v36 = vadd.f32 %v489_v34, %v453_v35 }
 0x18b   : > { %521 = vst [vmem:[#allocation8 + $0x30] sm:$0xff] %v505_v36 }
 0x18c   : > { %v474_v38 = vpop.f32.mrf.mxu3 }
 0x18d   : > { %v512_v39 = vadd.f32 %v496_v37, %v474_v38 }
 0x18f   : > { %528 = vst [vmem:[#allocation8 + $0x68] sm:$0xff] %v512_v39 }
 0x190   : > { %v456_v41 = vpop.f32.mrf.mxu1 }
 0x191   : > { %v506_v42 = vadd.f32 %v490_v40, %v456_v41 }
 0x193   : > { %522 = vst [vmem:[#allocation8 + $0x38] sm:$0xff] %v506_v42 }
 0x194   : > { %v477_v44 = vpop.f32.mrf.mxu3 }
 0x195   : > { %v513_v45 = vadd.f32 %v497_v43, %v477_v44 }
 0x197   : > { %529 = vst [vmem:[#allocation8 + $0x70] sm:$0xff] %v513_v45 }
 0x19b   : > { %534 = sbr.rel (%p710_p2) target bundleno = 436 (0x1b4), region = 56 }
 0x19c   : > { %v480_v47 = vpop.f32.mrf.mxu3 }
 0x19d   : > { %v514_v48 = vadd.f32 %v498_v46, %v480_v47 }
 0x19f   : > { %530 = vst [vmem:[#allocation8 + $0x78] sm:$0xff] %v514_v48 }
 0x1a0   : > { %v535_v49 = vld [vmem:[#allocation8] sm:$0xff]  ;;  %v536_v51 = vld [vmem:[#allocation8 + $0x8] sm:$0xff]  ;;  %v537_v52 = vld [vmem:[#allocation8 + $0x10] sm:$0xff] }
 0x1a1   : > { %v832_v50 = vld [vmem:[%s1212_s3] ss:$0 sm:$0xff]  ;;  %v538_v53 = vld [vmem:[#allocation8 + $0x18] sm:$0xff]  ;;  %v540_v58 = vld [vmem:[#allocation8 + $0x28] sm:$0xff] }
 0x1a2   : > { %v555_v54 = vadd.f32 %v832_v50, %v535_v49  ;;  %v556_v55 = vadd.f32 %v832_v50, %v536_v51  ;;  %v557_v56 = vadd.f32 %v832_v50, %v537_v52  ;;  %v539_v57 = vld [vmem:[#allocation8 + $0x20] sm:$0xff]  ;;  %v558_v59 = vadd.f32 %v832_v50, %v538_v53  ;;  %v541_v60 = vld [vmem:[#allocation8 + $0x30] sm:$0xff]  ;;  %v542_v62 = vld [vmem:[#allocation8 + $0x38] sm:$0xff] }
 0x1a3   : > { %v559_v61 = vadd.f32 %v832_v50, %v539_v57  ;;  %v560_v63 = vadd.f32 %v832_v50, %v540_v58  ;;  %v543_v0 = vld [vmem:[#allocation8 + $0x40] sm:$0xff]  ;;  %v561_v1 = vadd.f32 %v832_v50, %v541_v60  ;;  %v544_v2 = vld [vmem:[#allocation8 + $0x48] sm:$0xff]  ;;  %v562_v3 = vadd.f32 %v832_v50, %v542_v62  ;;  %v545_v4 = vld [vmem:[#allocation8 + $0x50] sm:$0xff] }
 0x1a4   : > { %571 = vst [vmem:[#allocation8] sm:$0xff] %v555_v54  ;;  %v563_v5 = vadd.f32 %v832_v50, %v543_v0  ;;  %v546_v6 = vld [vmem:[#allocation8 + $0x58] sm:$0xff]  ;;  %v564_v7 = vadd.f32 %v832_v50, %v544_v2  ;;  %v547_v8 = vld [vmem:[#allocation8 + $0x60] sm:$0xff]  ;;  %v565_v9 = vadd.f32 %v832_v50, %v545_v4  ;;  %v548_v10 = vld [vmem:[#allocation8 + $0x68] sm:$0xff] }
 0x1a5   : > { %572 = vst [vmem:[#allocation8 + $0x8] sm:$0xff] %v556_v55  ;;  %v566_v11 = vadd.f32 %v832_v50, %v546_v6  ;;  %v549_v12 = vld [vmem:[#allocation8 + $0x70] sm:$0xff]  ;;  %v567_v13 = vadd.f32 %v832_v50, %v547_v8  ;;  %v568_v15 = vadd.f32 %v832_v50, %v548_v10 }
 0x1a6   : > { %573 = vst [vmem:[#allocation8 + $0x10] sm:$0xff] %v557_v56  ;;  %v550_v14 = vld [vmem:[#allocation8 + $0x78] sm:$0xff]  ;;  %v569_v16 = vadd.f32 %v832_v50, %v549_v12 }
 0x1a7   : > { %574 = vst [vmem:[#allocation8 + $0x18] sm:$0xff] %v558_v59  ;;  %v570_v17 = vadd.f32 %v832_v50, %v550_v14 }
 0x1a8   : > { %575 = vst [vmem:[#allocation8 + $0x20] sm:$0xff] %v559_v61 }
 0x1a9   : > { %576 = vst [vmem:[#allocation8 + $0x28] sm:$0xff] %v560_v63 }
 0x1aa   : > { %577 = vst [vmem:[#allocation8 + $0x30] sm:$0xff] %v561_v1 }
 0x1ab   : > { %578 = vst [vmem:[#allocation8 + $0x38] sm:$0xff] %v562_v3 }
 0x1ac   : > { %579 = vst [vmem:[#allocation8 + $0x40] sm:$0xff] %v563_v5 }
 0x1ad   : > { %580 = vst [vmem:[#allocation8 + $0x48] sm:$0xff] %v564_v7 }
 0x1ae   : > { %581 = vst [vmem:[#allocation8 + $0x50] sm:$0xff] %v565_v9 }
 0x1af   : > { %582 = vst [vmem:[#allocation8 + $0x58] sm:$0xff] %v566_v11 }
 0x1b0   : > { %583 = vst [vmem:[#allocation8 + $0x60] sm:$0xff] %v567_v13 }
 0x1b1   : > { %584 = vst [vmem:[#allocation8 + $0x68] sm:$0xff] %v568_v15 }
 0x1b2   : > { %585 = vst [vmem:[#allocation8 + $0x70] sm:$0xff] %v569_v16 }
 0x1b3   : > { %586 = vst [vmem:[#allocation8 + $0x78] sm:$0xff] %v570_v17 }
 0x1b4 PF: > { %p775_p3 = scmp.eq.s32.totalorder %s1112_s23, 2  ;;  %s597_s26 = sshll.u32 %s1213_s4, 4  ;;  %s598_s26 = int_to_ptr.hbm [resolvable:$true] %s597_s26 }
 0x1b5   : > { %s1019_s30 = smov [#allocation8]   ;;  %s1020_s25 = smov 128  }
 0x1b6   : > { %s595_s5 = sshll.u32 %s1019_s30, 4  ;;  %s1021_s29 = smov 8   ;;  %s596_s5 = int_to_ptr.vmem [resolvable:$true] %s595_s5 }
 0x1b7   : > { %758 = dma.vmem_to_hbm [thread:$0]  (%p775_p3), %s596_s5, 2048, %s598_s26, [#allocation4], %s1020_s25, %s1020_s25, %s1021_s29  }
 0x1b8   : > { %988 = dma.done.wait (%p775_p3), [#allocation4], 2048  }
 0x1b9   : > { %990 = vsyncadd (%p775_p3), [#allocation4], 4294965248 }
 0x1ba PF: > { %s19_s20 = sadd.s32 1, %s1013_s20   ;;  %s1217_s15 = smov %s997_s16 }
 0x1bb   : > { %p16_p4 = scmp.ge.s32.totalorder %s19_s20, 5   ;;  %s1218_s16 = smov %s1001_s17 }
 0x1bc   : > { %s1219_s17 = smov %s1094_s27  ;;  %s1220_s18 = smov %s1009_s19 }
 0x1bd   : > { %s1221_s19 = smov %s1223_s21  ;;  %18 = sbr.rel (!%p16_p4) target bundleno = 6 (0x6), region = 97 }
 0x1c2   :  { %614 = vsyncpa [#allocation3], 1 }
 0x1c3   :  { %616 = vsyncpa [#allocation3 + $0x1], 1 }
 0x1c4   :  { %617 = vsyncpa [#allocation6], 1 }
 0x1c5   :  { %618 = vsyncpa [#allocation4], 1 }
 0x1c6   :  { %620 = vsyncpa [#allocation4 + $0x1], 1 }

</bundles_post_ra>
